<compile_context>
chip_gen: v6e
topology: v6e:2x2x1
jax: 0.10.0
libtpu: 0.0.40
codegen_flags: <defaults>
</compile_context>

<pallas_src>
import numpy as np
import jax
import jax.numpy as jnp
from jax import lax
from jax.experimental import pallas as pl
from jax.experimental.pallas import tpu as pltpu


def _round_up(x, m):
    return (x + m - 1) // m * m


# ----------------------------- Pallas kernels ------------------------------

def _conv_block_kernel(p_ref, w_ref, aux_ref, o_ref):
    # p_ref: (TM, K) patch tile, w_ref: (K, Cout),
    # aux_ref: (3, Cout) = [conv bias; BN scale; BN shift]
    z = jnp.dot(p_ref[...], w_ref[...], preferred_element_type=jnp.float32)
    z = z + aux_ref[0:1, :]                               # conv bias
    a = jnp.where(z > 0, z, 0.2 * z)                      # LeakyReLU(0.2)
    o_ref[...] = a * aux_ref[1:2, :] + aux_ref[2:3, :]    # eval-mode BatchNorm


def _head_kernel(x_ref, w_ref, aux_ref, o_ref):
    # x_ref: (TM, F), w_ref: (F, 1), aux_ref: (1, 1) bias
    z = jnp.dot(x_ref[...], w_ref[...], preferred_element_type=jnp.float32)
    z = z + aux_ref[0:1, :]
    o_ref[...] = 1.0 / (1.0 + jnp.exp(-z))                # Sigmoid


def _pick_tm(M, K, N, tm_target=512, budget_bytes=12 * 1024 * 1024):
    """Row-tile size: aim for ~512 rows, bounded by a conservative VMEM budget
    (2x double-buffered lhs/out tiles + resident rhs/aux, all f32)."""
    fixed = (K * N + 8 * N) * 4                 # resident weights + aux rows
    per_row = 2 * (K + N) * 4                   # double-buffered lhs + out tile
    tm = min(tm_target, max(8, (budget_bytes - fixed) // per_row))
    tm = max(8, (int(tm) // 8) * 8)
    return min(tm, _round_up(M, 8))


def _fused_matmul(kernel, lhs, rhs, aux):
    """Tiled fused matmul: grid over rows of lhs; rhs/aux resident full-block.

    K and N use full-array blocks (no 128 padding of K or N); only lhs rows are
    padded up to a multiple of the row tile.
    """
    M, K = lhs.shape
    N = rhs.shape[1]
    tm = _pick_tm(M, K, N)
    Mp = _round_up(M, tm)
    lhs_p = lhs if Mp == M else jnp.pad(lhs, ((0, Mp - M), (0, 0)))

    out = pl.pallas_call(
        kernel,
        out_shape=jax.ShapeDtypeStruct((Mp, N), jnp.float32),
        grid=(Mp // tm,),
        in_specs=[pl.BlockSpec((tm, K), lambda i: (i, 0)),
                  pl.BlockSpec((K, N), lambda i: (0, 0)),
                  pl.BlockSpec(aux.shape, lambda i: (0, 0))],
        out_specs=pl.BlockSpec((tm, N), lambda i: (i, 0)),
        compiler_params=pltpu.CompilerParams(
            dimension_semantics=("parallel",),          # v7x: shard rows on 2 TCs
            vmem_limit_bytes=32 * 1024 * 1024),
    )(lhs_p, rhs, aux)
    return out if Mp == M else out[:M]


# ------------------------------ JAX glue ----------------------------------

def _im2col_nhwc(x, k=3, stride=2, pad=1):
    """NHWC -> (N*Ho*Wo, k*k*C) patch matrix; feature order = (kh, kw, C)."""
    N, H, W, C = x.shape
    xp = jnp.pad(x, ((0, 0), (pad, pad), (pad, pad), (0, 0)))
    Ho = (H + 2 * pad - k) // stride + 1
    Wo = (W + 2 * pad - k) // stride + 1
    cols = [xp[:, kh:kh + stride * Ho:stride, kw:kw + stride * Wo:stride, :]
            for kh in range(k) for kw in range(k)]            # each (N,Ho,Wo,C)
    patches = jnp.concatenate(cols, axis=-1).reshape(N * Ho * Wo, k * k * C)
    return patches, Ho, Wo


def init_params(key, img_size=16, img_channels=3, n_filters=16, n_blocks=3):
    """Torch-like eval-mode parameters (OIHW conv weights, folded BN affine)."""
    eps = 0.8   # BatchNorm2d(out_filters, 0.8) -> eps = 0.8
    cfg = [(img_channels, n_filters, False)]
    c = n_filters
    for _ in range(n_blocks):
        cfg.append((c, 2 * c, True))
        c *= 2

    convs = []
    for (cin, cout, norm) in cfg:
        key, k1, k2, k3, k4 = jax.random.split(key, 5)
        fan_in = cin * 9
        w = jax.random.normal(k1, (cout, cin, 3, 3), jnp.float32) / np.sqrt(fan_in)
        b = 0.05 * jax.random.normal(k2, (cout,), jnp.float32)
        if norm:
            gamma = 1.0 + 0.1 * jax.random.normal(k3, (cout,), jnp.float32)
            beta = 0.1 * jax.random.normal(k4, (cout,), jnp.float32)
            scale = gamma / jnp.sqrt(1.0 + eps)   # running_var = 1
            shift = beta                          # running_mean = 0
        else:
            scale = jnp.ones((cout,), jnp.float32)
            shift = jnp.zeros((cout,), jnp.float32)
        convs.append((w, b, scale, shift))

    ds = img_size // 2 ** (n_blocks + 1)
    feat = c * ds * ds
    key, k1, k2 = jax.random.split(key, 3)
    lin_w = jax.random.normal(k1, (1, feat), jnp.float32) / np.sqrt(feat)
    lin_b = 0.05 * jax.random.normal(k2, (1,), jnp.float32)
    return convs, lin_w, lin_b


def pack_params(convs, lin_w, lin_b, img_size):
    """One-time packing: conv W -> (9*Cin, Cout) in (kh,kw,C) order, aux rows
    stacked into (3, Cout); head weight columns permuted from torch's NCHW
    flatten order to our NHWC flatten order and transposed to (feat, 1)."""
    conv_packed = []
    for (w, b, scale, shift) in convs:
        cout, cin = w.shape[0], w.shape[1]
        wm = jnp.transpose(w, (2, 3, 1, 0)).reshape(9 * cin, cout)   # (kh,kw,C)->rows
        aux = jnp.stack([b, scale, shift], axis=0)                   # (3, Cout)
        conv_packed.append((wm, aux))
    cf = convs[-1][0].shape[0]
    ds = img_size // (2 ** len(convs))
    head_w = (lin_w.reshape(1, cf, ds, ds)
              .transpose(0, 2, 3, 1)            # torch (c,h,w) -> our (h,w,c)
              .reshape(1, -1).T)                # (feat, 1)
    head_aux = lin_b.reshape(1, 1)
    return conv_packed, head_w, head_aux


def discriminator_forward(x_nchw, packed):
    conv_packed, head_w, head_aux = packed
    out = jnp.transpose(x_nchw, (0, 2, 3, 1))   # NCHW -> NHWC once, at the input
    n = out.shape[0]
    for (wm, aux) in conv_packed:
        patches, ho, wo = _im2col_nhwc(out)
        y = _fused_matmul(_conv_block_kernel, patches, wm, aux)   # (N*Ho*Wo, Cout)
        out = y.reshape(n, ho, wo, wm.shape[1])                   # stays NHWC
    flat = out.reshape(n, -1)                    # NHWC flatten (head_w is permuted)
    return _fused_matmul(_head_kernel, flat, head_w, head_aux)


def reference_forward(x, convs, lin_w, lin_b):
    out = x
    for (w, b, scale, shift) in convs:
        out = lax.conv_general_dilated(
            out, w, (2, 2), ((1, 1), (1, 1)),
            dimension_numbers=('NCHW', 'OIHW', 'NCHW'))
        out = out + b[None, :, None, None]
        out = jnp.where(out > 0, out, 0.2 * out)
        out = out * scale[None, :, None, None] + shift[None, :, None, None]
    flat = out.reshape(out.shape[0], -1)
    return 1.0 / (1.0 + jnp.exp(-(flat @ lin_w.T + lin_b)))


if __name__ == "__main__":
    key = jax.random.PRNGKey(0)
    kx, kp = jax.random.split(key)
    B, C, S = 2, 3, 16                              # batch, img_channels, img_size
    img = jax.random.normal(kx, (B, C, S, S), jnp.float32)
    convs, lin_w, lin_b = init_params(kp, img_size=S, img_channels=C)
    packed = pack_params(convs, lin_w, lin_b, img_size=S)

    fwd = jax.jit(discriminator_forward)
    out = jax.block_until_ready(fwd(img, packed))
    ref = jax.block_until_ready(reference_forward(img, convs, lin_w, lin_b))

    assert out.shape == (B, 1), out.shape
    assert np.allclose(np.asarray(out), np.asarray(ref), rtol=1e-4, atol=1e-4)
    print("KERNEL_OK")
</pallas_src>

<mosaic_0001>
module attributes {stable_mosaic.version = 11 : i64} {
  func.func @_conv_block_kernel(%arg0: i32, %arg1: memref<128x27xf32, #tpu.memory_space<vmem>>, %arg2: memref<27x16xf32, #tpu.memory_space<vmem>>, %arg3: memref<3x16xf32, #tpu.memory_space<vmem>>, %arg4: memref<128x16xf32, #tpu.memory_space<vmem>>) attributes {dimension_semantics = [#tpu.dimension_semantics<parallel>], iteration_bounds = array<i64: 1>, scalar_prefetch = 0 : i64, scratch_operands = 0 : i64, tpu.core_type = #tpu.core_type<tc>, window_params = [{transform_indices = @transform_0, window_bounds = array<i64: 128, 27>}, {pipeline_mode = #tpu.pipeline_mode<synchronous>, transform_indices = @transform_1, window_bounds = array<i64: 27, 16>}, {pipeline_mode = #tpu.pipeline_mode<synchronous>, transform_indices = @transform_2, window_bounds = array<i64: 3, 16>}, {transform_indices = @transform_3, window_bounds = array<i64: 128, 16>}]} {
    %c0 = arith.constant 0 : index
    %c0_0 = arith.constant 0 : index
    %0 = vector.load %arg1[%c0, %c0_0] : memref<128x27xf32, #tpu.memory_space<vmem>>, vector<128x27xf32>
    %c0_1 = arith.constant 0 : index
    %c0_2 = arith.constant 0 : index
    %1 = vector.load %arg2[%c0_1, %c0_2] : memref<27x16xf32, #tpu.memory_space<vmem>>, vector<27x16xf32>
    %cst = arith.constant dense<0.000000e+00> : vector<128x16xf32>
    %2 = tpu.matmul %0, %1, %cst {dimension_numbers = #tpu.dot_dimension_numbers<[1], [0], [0], [1], [0, 0, 1, 1], [], []>} : vector<128x27xf32>, vector<27x16xf32>, vector<128x16xf32> -> vector<128x16xf32>
    %c0_3 = arith.constant 0 : index
    %c0_4 = arith.constant 0 : index
    %3 = vector.load %arg3[%c0_3, %c0_4] : memref<3x16xf32, #tpu.memory_space<vmem>>, vector<1x16xf32>
    %4 = vector.broadcast %3 : vector<1x16xf32> to vector<128x16xf32>
    %5 = arith.addf %2, %4 : vector<128x16xf32>
    %cst_5 = arith.constant 0.000000e+00 : f32
    %6 = vector.broadcast %cst_5 : f32 to vector<128x16xf32>
    %7 = arith.cmpf ogt, %5, %6 : vector<128x16xf32>
    %cst_6 = arith.constant 2.000000e-01 : f32
    %8 = vector.broadcast %cst_6 : f32 to vector<128x16xf32>
    %9 = arith.mulf %8, %5 : vector<128x16xf32>
    %10 = arith.select %7, %5, %9 : vector<128x16xi1>, vector<128x16xf32>
    %c1 = arith.constant 1 : index
    %c0_7 = arith.constant 0 : index
    %11 = vector.load %arg3[%c1, %c0_7] : memref<3x16xf32, #tpu.memory_space<vmem>>, vector<1x16xf32>
    %12 = vector.broadcast %11 : vector<1x16xf32> to vector<128x16xf32>
    %13 = arith.mulf %10, %12 : vector<128x16xf32>
    %c2 = arith.constant 2 : index
    %c0_8 = arith.constant 0 : index
    %14 = vector.load %arg3[%c2, %c0_8] : memref<3x16xf32, #tpu.memory_space<vmem>>, vector<1x16xf32>
    %15 = vector.broadcast %14 : vector<1x16xf32> to vector<128x16xf32>
    %16 = arith.addf %13, %15 : vector<128x16xf32>
    %c0_9 = arith.constant 0 : index
    %c0_10 = arith.constant 0 : index
    %17 = vector.load %arg4[%c0_9, %c0_10] : memref<128x16xf32, #tpu.memory_space<vmem>>, vector<128x16xf32>
    tpu.vector_store %arg4[%c0_9, %c0_10], %16 {strides = array<i32>} : memref<128x16xf32, #tpu.memory_space<vmem>>, vector<128x16xf32>,
    return
  }
  func.func @transform_0(%arg0: i32) -> (i32, i32) {
    %c0_i32 = arith.constant 0 : i32
    %c0_i32_0 = arith.constant 0 : i32
    return %arg0, %c0_i32 : i32, i32
  }
  func.func @transform_1(%arg0: i32) -> (i32, i32) {
    %c0_i32 = arith.constant 0 : i32
    %c0_i32_0 = arith.constant 0 : i32
    %c0_i32_1 = arith.constant 0 : i32
    return %c0_i32, %c0_i32_0 : i32, i32
  }
  func.func @transform_2(%arg0: i32) -> (i32, i32) {
    %c0_i32 = arith.constant 0 : i32
    %c0_i32_0 = arith.constant 0 : i32
    %c0_i32_1 = arith.constant 0 : i32
    return %c0_i32, %c0_i32_0 : i32, i32
  }
  func.func @transform_3(%arg0: i32) -> (i32, i32) {
    %c0_i32 = arith.constant 0 : i32
    %c0_i32_0 = arith.constant 0 : i32
    return %arg0, %c0_i32 : i32, i32
  }
}

module attributes {stable_mosaic.version = 11 : i64} {
  func.func @_conv_block_kernel(%arg0: i32, %arg1: memref<32x144xf32, #tpu.memory_space<vmem>>, %arg2: memref<144x32xf32, #tpu.memory_space<vmem>>, %arg3: memref<3x32xf32, #tpu.memory_space<vmem>>, %arg4: memref<32x32xf32, #tpu.memory_space<vmem>>) attributes {dimension_semantics = [#tpu.dimension_semantics<parallel>], iteration_bounds = array<i64: 1>, scalar_prefetch = 0 : i64, scratch_operands = 0 : i64, tpu.core_type = #tpu.core_type<tc>, window_params = [{transform_indices = @transform_0, window_bounds = array<i64: 32, 144>}, {pipeline_mode = #tpu.pipeline_mode<synchronous>, transform_indices = @transform_1, window_bounds = array<i64: 144, 32>}, {pipeline_mode = #tpu.pipeline_mode<synchronous>, transform_indices = @transform_2, window_bounds = array<i64: 3, 32>}, {transform_indices = @transform_3, window_bounds = array<i64: 32, 32>}]} {
    %c0 = arith.constant 0 : index
    %c0_0 = arith.constant 0 : index
    %0 = vector.load %arg1[%c0, %c0_0] : memref<32x144xf32, #tpu.memory_space<vmem>>, vector<32x144xf32>
    %c0_1 = arith.constant 0 : index
    %c0_2 = arith.constant 0 : index
    %1 = vector.load %arg2[%c0_1, %c0_2] : memref<144x32xf32, #tpu.memory_space<vmem>>, vector<144x32xf32>
    %cst = arith.constant dense<0.000000e+00> : vector<32x32xf32>
    %2 = tpu.matmul %0, %1, %cst {dimension_numbers = #tpu.dot_dimension_numbers<[1], [0], [0], [1], [0, 0, 1, 1], [], []>} : vector<32x144xf32>, vector<144x32xf32>, vector<32x32xf32> -> vector<32x32xf32>
    %c0_3 = arith.constant 0 : index
    %c0_4 = arith.constant 0 : index
    %3 = vector.load %arg3[%c0_3, %c0_4] : memref<3x32xf32, #tpu.memory_space<vmem>>, vector<1x32xf32>
    %4 = vector.broadcast %3 : vector<1x32xf32> to vector<32x32xf32>
    %5 = arith.addf %2, %4 : vector<32x32xf32>
    %cst_5 = arith.constant 0.000000e+00 : f32
    %6 = vector.broadcast %cst_5 : f32 to vector<32x32xf32>
    %7 = arith.cmpf ogt, %5, %6 : vector<32x32xf32>
    %cst_6 = arith.constant 2.000000e-01 : f32
    %8 = vector.broadcast %cst_6 : f32 to vector<32x32xf32>
    %9 = arith.mulf %8, %5 : vector<32x32xf32>
    %10 = arith.select %7, %5, %9 : vector<32x32xi1>, vector<32x32xf32>
    %c1 = arith.constant 1 : index
    %c0_7 = arith.constant 0 : index
    %11 = vector.load %arg3[%c1, %c0_7] : memref<3x32xf32, #tpu.memory_space<vmem>>, vector<1x32xf32>
    %12 = vector.broadcast %11 : vector<1x32xf32> to vector<32x32xf32>
    %13 = arith.mulf %10, %12 : vector<32x32xf32>
    %c2 = arith.constant 2 : index
    %c0_8 = arith.constant 0 : index
    %14 = vector.load %arg3[%c2, %c0_8] : memref<3x32xf32, #tpu.memory_space<vmem>>, vector<1x32xf32>
    %15 = vector.broadcast %14 : vector<1x32xf32> to vector<32x32xf32>
    %16 = arith.addf %13, %15 : vector<32x32xf32>
    %c0_9 = arith.constant 0 : index
    %c0_10 = arith.constant 0 : index
    %17 = vector.load %arg4[%c0_9, %c0_10] : memref<32x32xf32, #tpu.memory_space<vmem>>, vector<32x32xf32>
    tpu.vector_store %arg4[%c0_9, %c0_10], %16 {strides = array<i32>} : memref<32x32xf32, #tpu.memory_space<vmem>>, vector<32x32xf32>,
    return
  }
  func.func @transform_0(%arg0: i32) -> (i32, i32) {
    %c0_i32 = arith.constant 0 : i32
    %c0_i32_0 = arith.constant 0 : i32
    return %arg0, %c0_i32 : i32, i32
  }
  func.func @transform_1(%arg0: i32) -> (i32, i32) {
    %c0_i32 = arith.constant 0 : i32
    %c0_i32_0 = arith.constant 0 : i32
    %c0_i32_1 = arith.constant 0 : i32
    return %c0_i32, %c0_i32_0 : i32, i32
  }
  func.func @transform_2(%arg0: i32) -> (i32, i32) {
    %c0_i32 = arith.constant 0 : i32
    %c0_i32_0 = arith.constant 0 : i32
    %c0_i32_1 = arith.constant 0 : i32
    return %c0_i32, %c0_i32_0 : i32, i32
  }
  func.func @transform_3(%arg0: i32) -> (i32, i32) {
    %c0_i32 = arith.constant 0 : i32
    %c0_i32_0 = arith.constant 0 : i32
    return %arg0, %c0_i32 : i32, i32
  }
}

module attributes {stable_mosaic.version = 11 : i64} {
  func.func @_conv_block_kernel(%arg0: i32, %arg1: memref<8x288xf32, #tpu.memory_space<vmem>>, %arg2: memref<288x64xf32, #tpu.memory_space<vmem>>, %arg3: memref<3x64xf32, #tpu.memory_space<vmem>>, %arg4: memref<8x64xf32, #tpu.memory_space<vmem>>) attributes {dimension_semantics = [#tpu.dimension_semantics<parallel>], iteration_bounds = array<i64: 1>, scalar_prefetch = 0 : i64, scratch_operands = 0 : i64, tpu.core_type = #tpu.core_type<tc>, window_params = [{transform_indices = @transform_0, window_bounds = array<i64: 8, 288>}, {pipeline_mode = #tpu.pipeline_mode<synchronous>, transform_indices = @transform_1, window_bounds = array<i64: 288, 64>}, {pipeline_mode = #tpu.pipeline_mode<synchronous>, transform_indices = @transform_2, window_bounds = array<i64: 3, 64>}, {transform_indices = @transform_3, window_bounds = array<i64: 8, 64>}]} {
    %c0 = arith.constant 0 : index
    %c0_0 = arith.constant 0 : index
    %0 = vector.load %arg1[%c0, %c0_0] : memref<8x288xf32, #tpu.memory_space<vmem>>, vector<8x288xf32>
    %c0_1 = arith.constant 0 : index
    %c0_2 = arith.constant 0 : index
    %1 = vector.load %arg2[%c0_1, %c0_2] : memref<288x64xf32, #tpu.memory_space<vmem>>, vector<288x64xf32>
    %cst = arith.constant dense<0.000000e+00> : vector<8x64xf32>
    %2 = tpu.matmul %0, %1, %cst {dimension_numbers = #tpu.dot_dimension_numbers<[1], [0], [0], [1], [0, 0, 1, 1], [], []>} : vector<8x288xf32>, vector<288x64xf32>, vector<8x64xf32> -> vector<8x64xf32>
    %c0_3 = arith.constant 0 : index
    %c0_4 = arith.constant 0 : index
    %3 = vector.load %arg3[%c0_3, %c0_4] : memref<3x64xf32, #tpu.memory_space<vmem>>, vector<1x64xf32>
    %4 = vector.broadcast %3 : vector<1x64xf32> to vector<8x64xf32>
    %5 = arith.addf %2, %4 : vector<8x64xf32>
    %cst_5 = arith.constant 0.000000e+00 : f32
    %6 = vector.broadcast %cst_5 : f32 to vector<8x64xf32>
    %7 = arith.cmpf ogt, %5, %6 : vector<8x64xf32>
    %cst_6 = arith.constant 2.000000e-01 : f32
    %8 = vector.broadcast %cst_6 : f32 to vector<8x64xf32>
    %9 = arith.mulf %8, %5 : vector<8x64xf32>
    %10 = arith.select %7, %5, %9 : vector<8x64xi1>, vector<8x64xf32>
    %c1 = arith.constant 1 : index
    %c0_7 = arith.constant 0 : index
    %11 = vector.load %arg3[%c1, %c0_7] : memref<3x64xf32, #tpu.memory_space<vmem>>, vector<1x64xf32>
    %12 = vector.broadcast %11 : vector<1x64xf32> to vector<8x64xf32>
    %13 = arith.mulf %10, %12 : vector<8x64xf32>
    %c2 = arith.constant 2 : index
    %c0_8 = arith.constant 0 : index
    %14 = vector.load %arg3[%c2, %c0_8] : memref<3x64xf32, #tpu.memory_space<vmem>>, vector<1x64xf32>
    %15 = vector.broadcast %14 : vector<1x64xf32> to vector<8x64xf32>
    %16 = arith.addf %13, %15 : vector<8x64xf32>
    %c0_9 = arith.constant 0 : index
    %c0_10 = arith.constant 0 : index
    %17 = vector.load %arg4[%c0_9, %c0_10] : memref<8x64xf32, #tpu.memory_space<vmem>>, vector<8x64xf32>
    tpu.vector_store %arg4[%c0_9, %c0_10], %16 {strides = array<i32>} : memref<8x64xf32, #tpu.memory_space<vmem>>, vector<8x64xf32>,
    return
  }
  func.func @transform_0(%arg0: i32) -> (i32, i32) {
    %c0_i32 = arith.constant 0 : i32
    %c0_i32_0 = arith.constant 0 : i32
    return %arg0, %c0_i32 : i32, i32
  }
  func.func @transform_1(%arg0: i32) -> (i32, i32) {
    %c0_i32 = arith.constant 0 : i32
    %c0_i32_0 = arith.constant 0 : i32
    %c0_i32_1 = arith.constant 0 : i32
    return %c0_i32, %c0_i32_0 : i32, i32
  }
  func.func @transform_2(%arg0: i32) -> (i32, i32) {
    %c0_i32 = arith.constant 0 : i32
    %c0_i32_0 = arith.constant 0 : i32
    %c0_i32_1 = arith.constant 0 : i32
    return %c0_i32, %c0_i32_0 : i32, i32
  }
  func.func @transform_3(%arg0: i32) -> (i32, i32) {
    %c0_i32 = arith.constant 0 : i32
    %c0_i32_0 = arith.constant 0 : i32
    return %arg0, %c0_i32 : i32, i32
  }
}

module attributes {stable_mosaic.version = 11 : i64} {
  func.func @_conv_block_kernel(%arg0: i32, %arg1: memref<8x576xf32, #tpu.memory_space<vmem>>, %arg2: memref<576x128xf32, #tpu.memory_space<vmem>>, %arg3: memref<3x128xf32, #tpu.memory_space<vmem>>, %arg4: memref<8x128xf32, #tpu.memory_space<vmem>>) attributes {dimension_semantics = [#tpu.dimension_semantics<parallel>], iteration_bounds = array<i64: 1>, scalar_prefetch = 0 : i64, scratch_operands = 0 : i64, tpu.core_type = #tpu.core_type<tc>, window_params = [{transform_indices = @transform_0, window_bounds = array<i64: 8, 576>}, {pipeline_mode = #tpu.pipeline_mode<synchronous>, transform_indices = @transform_1, window_bounds = array<i64: 576, 128>}, {pipeline_mode = #tpu.pipeline_mode<synchronous>, transform_indices = @transform_2, window_bounds = array<i64: 3, 128>}, {transform_indices = @transform_3, window_bounds = array<i64: 8, 128>}]} {
    %c0 = arith.constant 0 : index
    %c0_0 = arith.constant 0 : index
    %0 = vector.load %arg1[%c0, %c0_0] : memref<8x576xf32, #tpu.memory_space<vmem>>, vector<8x576xf32>
    %c0_1 = arith.constant 0 : index
    %c0_2 = arith.constant 0 : index
    %1 = vector.load %arg2[%c0_1, %c0_2] : memref<576x128xf32, #tpu.memory_space<vmem>>, vector<576x128xf32>
    %cst = arith.constant dense<0.000000e+00> : vector<8x128xf32>
    %2 = tpu.matmul %0, %1, %cst {dimension_numbers = #tpu.dot_dimension_numbers<[1], [0], [0], [1], [0, 0, 1, 1], [], []>} : vector<8x576xf32>, vector<576x128xf32>, vector<8x128xf32> -> vector<8x128xf32>
    %c0_3 = arith.constant 0 : index
    %c0_4 = arith.constant 0 : index
    %3 = vector.load %arg3[%c0_3, %c0_4] : memref<3x128xf32, #tpu.memory_space<vmem>>, vector<1x128xf32>
    %4 = vector.broadcast %3 : vector<1x128xf32> to vector<8x128xf32>
    %5 = arith.addf %2, %4 : vector<8x128xf32>
    %cst_5 = arith.constant 0.000000e+00 : f32
    %6 = vector.broadcast %cst_5 : f32 to vector<8x128xf32>
    %7 = arith.cmpf ogt, %5, %6 : vector<8x128xf32>
    %cst_6 = arith.constant 2.000000e-01 : f32
    %8 = vector.broadcast %cst_6 : f32 to vector<8x128xf32>
    %9 = arith.mulf %8, %5 : vector<8x128xf32>
    %10 = arith.select %7, %5, %9 : vector<8x128xi1>, vector<8x128xf32>
    %c1 = arith.constant 1 : index
    %c0_7 = arith.constant 0 : index
    %11 = vector.load %arg3[%c1, %c0_7] : memref<3x128xf32, #tpu.memory_space<vmem>>, vector<1x128xf32>
    %12 = vector.broadcast %11 : vector<1x128xf32> to vector<8x128xf32>
    %13 = arith.mulf %10, %12 : vector<8x128xf32>
    %c2 = arith.constant 2 : index
    %c0_8 = arith.constant 0 : index
    %14 = vector.load %arg3[%c2, %c0_8] : memref<3x128xf32, #tpu.memory_space<vmem>>, vector<1x128xf32>
    %15 = vector.broadcast %14 : vector<1x128xf32> to vector<8x128xf32>
    %16 = arith.addf %13, %15 : vector<8x128xf32>
    %c0_9 = arith.constant 0 : index
    %c0_10 = arith.constant 0 : index
    %17 = vector.load %arg4[%c0_9, %c0_10] : memref<8x128xf32, #tpu.memory_space<vmem>>, vector<8x128xf32>
    tpu.vector_store %arg4[%c0_9, %c0_10], %16 {strides = array<i32>} : memref<8x128xf32, #tpu.memory_space<vmem>>, vector<8x128xf32>,
    return
  }
  func.func @transform_0(%arg0: i32) -> (i32, i32) {
    %c0_i32 = arith.constant 0 : i32
    %c0_i32_0 = arith.constant 0 : i32
    return %arg0, %c0_i32 : i32, i32
  }
  func.func @transform_1(%arg0: i32) -> (i32, i32) {
    %c0_i32 = arith.constant 0 : i32
    %c0_i32_0 = arith.constant 0 : i32
    %c0_i32_1 = arith.constant 0 : i32
    return %c0_i32, %c0_i32_0 : i32, i32
  }
  func.func @transform_2(%arg0: i32) -> (i32, i32) {
    %c0_i32 = arith.constant 0 : i32
    %c0_i32_0 = arith.constant 0 : i32
    %c0_i32_1 = arith.constant 0 : i32
    return %c0_i32, %c0_i32_0 : i32, i32
  }
  func.func @transform_3(%arg0: i32) -> (i32, i32) {
    %c0_i32 = arith.constant 0 : i32
    %c0_i32_0 = arith.constant 0 : i32
    return %arg0, %c0_i32 : i32, i32
  }
}

module attributes {stable_mosaic.version = 11 : i64} {
  func.func @_head_kernel(%arg0: i32, %arg1: memref<8x128xf32, #tpu.memory_space<vmem>>, %arg2: memref<128x1xf32, #tpu.memory_space<vmem>>, %arg3: memref<1x1xf32, #tpu.memory_space<vmem>>, %arg4: memref<8x1xf32, #tpu.memory_space<vmem>>) attributes {dimension_semantics = [#tpu.dimension_semantics<parallel>], iteration_bounds = array<i64: 1>, scalar_prefetch = 0 : i64, scratch_operands = 0 : i64, tpu.core_type = #tpu.core_type<tc>, window_params = [{transform_indices = @transform_0, window_bounds = array<i64: 8, 128>}, {pipeline_mode = #tpu.pipeline_mode<synchronous>, transform_indices = @transform_1, window_bounds = array<i64: 128, 1>}, {pipeline_mode = #tpu.pipeline_mode<synchronous>, transform_indices = @transform_2, window_bounds = array<i64: 1, 1>}, {transform_indices = @transform_3, window_bounds = array<i64: 8, 1>}]} {
    %c0 = arith.constant 0 : index
    %c0_0 = arith.constant 0 : index
    %0 = vector.load %arg1[%c0, %c0_0] : memref<8x128xf32, #tpu.memory_space<vmem>>, vector<8x128xf32>
    %c0_1 = arith.constant 0 : index
    %c0_2 = arith.constant 0 : index
    %1 = vector.load %arg2[%c0_1, %c0_2] : memref<128x1xf32, #tpu.memory_space<vmem>>, vector<128x1xf32>
    %cst = arith.constant dense<0.000000e+00> : vector<8x1xf32>
    %2 = tpu.matmul %0, %1, %cst {dimension_numbers = #tpu.dot_dimension_numbers<[1], [0], [0], [1], [0, 0, 1, 1], [], []>} : vector<8x128xf32>, vector<128x1xf32>, vector<8x1xf32> -> vector<8x1xf32>
    %c0_3 = arith.constant 0 : index
    %c0_4 = arith.constant 0 : index
    %3 = vector.load %arg3[%c0_3, %c0_4] : memref<1x1xf32, #tpu.memory_space<vmem>>, vector<1x1xf32>
    %4 = vector.broadcast %3 : vector<1x1xf32> to vector<8x1xf32>
    %5 = arith.addf %2, %4 : vector<8x1xf32>
    %cst_5 = arith.constant 0.000000e+00 : f32
    %6 = vector.broadcast %cst_5 : f32 to vector<8x1xf32>
    %7 = arith.subf %6, %5 : vector<8x1xf32>
    %8 = math.exp %7 : vector<8x1xf32>
    %cst_6 = arith.constant 1.000000e+00 : f32
    %9 = vector.broadcast %cst_6 : f32 to vector<8x1xf32>
    %10 = arith.addf %9, %8 : vector<8x1xf32>
    %cst_7 = arith.constant 1.000000e+00 : f32
    %11 = vector.broadcast %cst_7 : f32 to vector<8x1xf32>
    %12 = arith.divf %11, %10 : vector<8x1xf32>
    %c0_8 = arith.constant 0 : index
    %c0_9 = arith.constant 0 : index
    %13 = vector.load %arg4[%c0_8, %c0_9] : memref<8x1xf32, #tpu.memory_space<vmem>>, vector<8x1xf32>
    tpu.vector_store %arg4[%c0_8, %c0_9], %12 {strides = array<i32>} : memref<8x1xf32, #tpu.memory_space<vmem>>, vector<8x1xf32>,
    return
  }
  func.func @transform_0(%arg0: i32) -> (i32, i32) {
    %c0_i32 = arith.constant 0 : i32
    %c0_i32_0 = arith.constant 0 : i32
    return %arg0, %c0_i32 : i32, i32
  }
  func.func @transform_1(%arg0: i32) -> (i32, i32) {
    %c0_i32 = arith.constant 0 : i32
    %c0_i32_0 = arith.constant 0 : i32
    %c0_i32_1 = arith.constant 0 : i32
    return %c0_i32, %c0_i32_0 : i32, i32
  }
  func.func @transform_2(%arg0: i32) -> (i32, i32) {
    %c0_i32 = arith.constant 0 : i32
    %c0_i32_0 = arith.constant 0 : i32
    %c0_i32_1 = arith.constant 0 : i32
    return %c0_i32, %c0_i32_0 : i32, i32
  }
  func.func @transform_3(%arg0: i32) -> (i32, i32) {
    %c0_i32 = arith.constant 0 : i32
    %c0_i32_0 = arith.constant 0 : i32
    return %arg0, %c0_i32 : i32, i32
  }
}

</mosaic_0001>

<bundles_post_ra>
// kernel: discriminator_forward.5
= control target key start
LH: loop header
LB: loop body
LE: loop exit
PB: predicated region body
PF: predicated region fallthrough
CT: control target
= control target key end

     0   :  { %vm88_vm0 = vcmask 1042432   ;;  %vm39_vm1 = vcmask 220160   ;;  %vm327_vm4 = vcmask 130048   ;;  %s653_s1 = inlined_call_operand.vmem [shape: f32[27,16], index: 1, kind: input, shape index: {}]   ;;  %s654_s0 = inlined_call_operand.vmem [shape: f32[128,27], index: 0, kind: input, shape index: {}]   ;;  %s655_s2 = inlined_call_operand.vmem [shape: f32[3,16], index: 2, kind: input, shape index: {}]   ;;  %s656_s3 = inlined_call_operand.vmem [shape: f32[128,16], index: 3, kind: output, shape index: {}]  }
   0x1   :  { %v33_v0 = vld [vmem:[%s653_s1 + $0x18] sm:$0x7]  ;;  %v32_v1 = vld [vmem:[%s653_s1 + $0x10] sm:$0xff]  ;;  %v31_v2 = vld [vmem:[%s653_s1 + $0x8] sm:$0xff] }
   0x2   :  { %388 = vmatprep.subr.msk.mxu0 %vm88_vm0, %v33_v0  ;;  %420 = vmatprep.subr.msk.mxu1 %vm88_vm0, %v33_v0  ;;  %v30_v3 = vld [vmem:[%s653_s1] sm:$0xff]  ;;  %v15_v6 = vld [vmem:[%s654_s0 + $0x8] sm:$0xff]  ;;  %v16_v8 = vld [vmem:[%s654_s0 + $0x10] sm:$0xff] }
   0x3   :  { %389 = vmatpush3.msk.msra.mxu0 %vm88_vm0, %v33_v0  ;;  %424 = vmatpush3.msk.msra.mxu1 %vm88_vm0, %v33_v0  ;;  %v14_v4 = vld [vmem:[%s654_s0] sm:$0xff]  ;;  %v23_v7 = vld [vmem:[%s654_s0 + $0x48] sm:$0xff]  ;;  %v24_v9 = vld [vmem:[%s654_s0 + $0x50] sm:$0xff] }
   0x4   :  { %390 = vmatprep.subr.mxu0 %v32_v1  ;;  %421 = vmatprep.subr.mxu1 %v32_v1  ;;  %v22_v5 = vld [vmem:[%s654_s0 + $0x40] sm:$0xff]  ;;  %v17_v10 = vld [vmem:[%s654_s0 + $0x18] sm:$0xff]  ;;  %v19_v14 = vld [vmem:[%s654_s0 + $0x28] sm:$0xff] }
   0x5   :  { %391 = vmatpush3.msra.mxu0 %v32_v1  ;;  %425 = vmatpush3.msra.mxu1 %v32_v1  ;;  %v25_v11 = vld [vmem:[%s654_s0 + $0x58] sm:$0xff]  ;;  %v18_v12 = vld [vmem:[%s654_s0 + $0x20] sm:$0xff]  ;;  %v27_v15 = vld [vmem:[%s654_s0 + $0x68] sm:$0xff] }
   0x6   :  { %392 = vmatprep.subr.mxu0 %v31_v2  ;;  %422 = vmatprep.subr.mxu1 %v31_v2  ;;  %v26_v13 = vld [vmem:[%s654_s0 + $0x60] sm:$0xff]  ;;  %v20_v16 = vld [vmem:[%s654_s0 + $0x30] sm:$0xff]  ;;  %v21_v18 = vld [vmem:[%s654_s0 + $0x38] sm:$0xff] }
   0x7   :  { %393 = vmatpush3.msra.mxu0 %v31_v2  ;;  %426 = vmatpush3.msra.mxu1 %v31_v2  ;;  %v28_v17 = vld [vmem:[%s654_s0 + $0x70] sm:$0xff]  ;;  %v29_v19 = vld [vmem:[%s654_s0 + $0x78] sm:$0xff]  ;;  %v527_v20 = vld [vmem:[%s655_s2] ss:$0 sm:$0xff] }
   0x8   :  { %394 = vmatprep.subr.mxu0 %v30_v3  ;;  %423 = vmatprep.subr.mxu1 %v30_v3  ;;  %v534_v25 = vld [vmem:[%s655_s2 + $0x1] ss:$0 sm:$0xff]  ;;  %v541_v35 = vld [vmem:[%s655_s2 + $0x2] ss:$0 sm:$0xff] }
   0x9   :  { %395 = vmatpush3.msra.mxu0 %v30_v3  ;;  %427 = vmatpush3.msra.mxu1 %v30_v3 }
   0xa   :  { %396 = vmatprep.mubr.msk.f32.mxu0 %vm39_vm1, %v14_v4  ;;  %408 = vmatprep.mubr.msk.f32.mxu1 %vm39_vm1, %v22_v5 }
   0xb   :  { %397 = vmatmul.mubr.msk.f32.vlgmr.msra.gmra.mxu0 %vm39_vm1, %v15_v6  ;;  %409 = vmatmul.mubr.msk.f32.vlgmr.msra.gmra.mxu1 %vm39_vm1, %v23_v7 }
   0xc   :  { %399 = vmatprep.mubr.msk.f32.mxu0 %vm39_vm1, %v16_v8  ;;  %411 = vmatprep.mubr.msk.f32.mxu1 %vm39_vm1, %v24_v9 }
   0xf   :  { %400 = vmatmul.mubr.msk.f32.gmra.mxu0 %vm39_vm1, %v17_v10  ;;  %412 = vmatmul.mubr.msk.f32.gmra.mxu1 %vm39_vm1, %v25_v11 }
  0x10   :  { %402 = vmatprep.mubr.msk.f32.mxu0 %vm39_vm1, %v18_v12  ;;  %414 = vmatprep.mubr.msk.f32.mxu1 %vm39_vm1, %v26_v13 }
  0x13   :  { %403 = vmatmul.mubr.msk.f32.gmra.mxu0 %vm39_vm1, %v19_v14  ;;  %415 = vmatmul.mubr.msk.f32.gmra.mxu1 %vm39_vm1, %v27_v15 }
  0x14   :  { %405 = vmatprep.mubr.msk.f32.mxu0 %vm39_vm1, %v20_v16  ;;  %417 = vmatprep.mubr.msk.f32.mxu1 %vm39_vm1, %v28_v17 }
  0x17   :  { %406 = vmatmul.mubr.msk.f32.gmra.mxu0 %vm39_vm1, %v21_v18  ;;  %418 = vmatmul.mubr.msk.f32.gmra.mxu1 %vm39_vm1, %v29_v19 }
  0xcb   :  { %v398_v21 = vpop.f32.mrf.mxu0  ;;  %v410_v22 = vpop.f32.mrf.mxu1 }
  0xcc   :  { %v164_v23 = vadd.f32 %v398_v21, %v527_v20  ;;  %v204_v24 = vadd.f32 %v410_v22, %v527_v20 }
  0xcd   :  { %v158_v26 = vpop.f32.mrf.mxu0  ;;  %v198_v27 = vpop.f32.mrf.mxu1 }
  0xce   :  { %vm238_vm2 = vcmp.gt.f32.partialorder %v164_v23, 0.0  ;;  %v254_v28 = vmul.f32 0.2, %v164_v23  ;;  %vm246_vm3 = vcmp.gt.f32.partialorder %v204_v24, 0.0  ;;  %v262_v29 = vmul.f32 0.2, %v204_v24 }
  0xcf   :  { %v159_v30 = vadd.f32 %v527_v20, %v158_v26  ;;  %v199_v31 = vadd.f32 %v527_v20, %v198_v27  ;;  %v401_v32 = vpop.f32.mrf.mxu0  ;;  %v413_v33 = vpop.f32.mrf.mxu1 }
  0xd0   :  { %v270_v34 = vsel %vm238_vm2, %v164_v23, %v254_v28  ;;  %v278_v36 = vsel %vm246_vm3, %v204_v24, %v262_v29  ;;  %v174_v37 = vadd.f32 %v401_v32, %v527_v20  ;;  %v214_v38 = vadd.f32 %v413_v33, %v527_v20 }
  0xd1   :  { %v291_v39 = vmul.f32 %v534_v25, %v270_v34  ;;  %v299_v40 = vmul.f32 %v534_v25, %v278_v36  ;;  %vm237_vm5 = vcmp.gt.f32.partialorder %v159_v30, 0.0  ;;  %v253_v41 = vmul.f32 0.2, %v159_v30  ;;  %v168_v42 = vpop.f32.mrf.mxu0  ;;  %v208_v43 = vpop.f32.mrf.mxu1 }
  0xd2   :  { %vm245_vm6 = vcmp.gt.f32.partialorder %v199_v31, 0.0  ;;  %v261_v44 = vmul.f32 0.2, %v199_v31  ;;  %vm240_vm7 = vcmp.gt.f32.partialorder %v174_v37, 0.0  ;;  %v256_v45 = vmul.f32 0.2, %v174_v37 }
  0xd3   :  { %v312_v46 = vadd.f32 %v541_v35, %v291_v39  ;;  %v320_v47 = vadd.f32 %v541_v35, %v299_v40  ;;  %v269_v48 = vsel %vm237_vm5, %v159_v30, %v253_v41  ;;  %vm248_vm8 = vcmp.gt.f32.partialorder %v214_v38, 0.0  ;;  %v404_v49 = vpop.f32.mrf.mxu0  ;;  %v416_v50 = vpop.f32.mrf.mxu1 }
  0xd4   :  { %v290_v51 = vmul.f32 %v534_v25, %v269_v48  ;;  %v277_v52 = vsel %vm245_vm6, %v199_v31, %v261_v44  ;;  %v272_v53 = vsel %vm240_vm7, %v174_v37, %v256_v45  ;;  %v264_v54 = vmul.f32 0.2, %v214_v38 }
  0xd5   :  { %329 = vst.msk [vmem:[%s656_s3 + $0x8] sm:$0xff] %vm327_vm4, %v312_v46  ;;  %337 = vst.msk [vmem:[%s656_s3 + $0x48] sm:$0xff] %vm327_vm4, %v320_v47  ;;  %v298_v55 = vmul.f32 %v534_v25, %v277_v52  ;;  %v293_v56 = vmul.f32 %v534_v25, %v272_v53  ;;  %v169_v57 = vadd.f32 %v527_v20, %v168_v42  ;;  %v178_v59 = vpop.f32.mrf.mxu0  ;;  %v218_v60 = vpop.f32.mrf.mxu1 }
  0xd6   :  { %v209_v58 = vadd.f32 %v527_v20, %v208_v43  ;;  %v311_v61 = vadd.f32 %v541_v35, %v290_v51  ;;  %v280_v62 = vsel %vm248_vm8, %v214_v38, %v264_v54  ;;  %v184_v63 = vadd.f32 %v404_v49, %v527_v20 }
  0xd7   :  { %v224_v0 = vadd.f32 %v416_v50, %v527_v20  ;;  %v319_v1 = vadd.f32 %v541_v35, %v298_v55  ;;  %v314_v2 = vadd.f32 %v541_v35, %v293_v56  ;;  %v301_v3 = vmul.f32 %v534_v25, %v280_v62  ;;  %v407_v6 = vpop.f32.mrf.mxu0  ;;  %v419_v10 = vpop.f32.mrf.mxu1 }
  0xd8   :  { %vm239_vm9 = vcmp.gt.f32.partialorder %v169_v57, 0.0  ;;  %328 = vst.msk [vmem:[%s656_s3] sm:$0xff] %vm327_vm4, %v311_v61  ;;  %v255_v4 = vmul.f32 0.2, %v169_v57  ;;  %vm247_vm10 = vcmp.gt.f32.partialorder %v209_v58, 0.0  ;;  %vm242_vm11 = vcmp.gt.f32.partialorder %v184_v63, 0.0 }
  0xd9   :  { %v263_v5 = vmul.f32 0.2, %v209_v58  ;;  %336 = vst.msk [vmem:[%s656_s3 + $0x40] sm:$0xff] %vm327_vm4, %v319_v1  ;;  %331 = vst.msk [vmem:[%s656_s3 + $0x18] sm:$0xff] %vm327_vm4, %v314_v2  ;;  %v322_v7 = vadd.f32 %v541_v35, %v301_v3  ;;  %v258_v8 = vmul.f32 0.2, %v184_v63  ;;  %v179_v13 = vadd.f32 %v527_v20, %v178_v59  ;;  %v188_v23 = vpop.f32.mrf.mxu0  ;;  %v228_v28 = vpop.f32.mrf.mxu1 }
  0xda   :  { %vm250_vm12 = vcmp.gt.f32.partialorder %v224_v0, 0.0  ;;  %v266_v9 = vmul.f32 0.2, %v224_v0  ;;  %v271_v11 = vsel %vm239_vm9, %v169_v57, %v255_v4  ;;  %v219_v14 = vadd.f32 %v527_v20, %v218_v60 }
  0xdb   :  { %v279_v12 = vsel %vm247_vm10, %v209_v58, %v263_v5  ;;  %339 = vst.msk [vmem:[%s656_s3 + $0x58] sm:$0xff] %vm327_vm4, %v322_v7  ;;  %v292_v15 = vmul.f32 %v534_v25, %v271_v11  ;;  %v274_v17 = vsel %vm242_vm11, %v184_v63, %v258_v8  ;;  %vm241_vm13 = vcmp.gt.f32.partialorder %v179_v13, 0.0 }
  0xdc   :  { %v300_v16 = vmul.f32 %v534_v25, %v279_v12  ;;  %v282_v18 = vsel %vm250_vm12, %v224_v0, %v266_v9  ;;  %v295_v19 = vmul.f32 %v534_v25, %v274_v17  ;;  %v257_v22 = vmul.f32 0.2, %v179_v13 }
  0xdd   :  { %v303_v21 = vmul.f32 %v534_v25, %v282_v18  ;;  %v313_v24 = vadd.f32 %v541_v35, %v292_v15  ;;  %vm249_vm14 = vcmp.gt.f32.partialorder %v219_v14, 0.0  ;;  %v265_v27 = vmul.f32 0.2, %v219_v14 }
  0xde   :  { %v321_v26 = vadd.f32 %v541_v35, %v300_v16  ;;  %v316_v29 = vadd.f32 %v541_v35, %v295_v19  ;;  %v273_v31 = vsel %vm241_vm13, %v179_v13, %v257_v22  ;;  %v194_v32 = vadd.f32 %v407_v6, %v527_v20 }
  0xdf   :  { %v324_v30 = vadd.f32 %v541_v35, %v303_v21  ;;  %330 = vst.msk [vmem:[%s656_s3 + $0x10] sm:$0xff] %vm327_vm4, %v313_v24  ;;  %v294_v33 = vmul.f32 %v534_v25, %v273_v31  ;;  %v281_v34 = vsel %vm249_vm14, %v219_v14, %v265_v27  ;;  %v234_v36 = vadd.f32 %v419_v10, %v527_v20 }
  0xe0   :  { %338 = vst.msk [vmem:[%s656_s3 + $0x50] sm:$0xff] %vm327_vm4, %v321_v26  ;;  %v189_v37 = vadd.f32 %v527_v20, %v188_v23  ;;  %333 = vst.msk [vmem:[%s656_s3 + $0x28] sm:$0xff] %vm327_vm4, %v316_v29  ;;  %v302_v38 = vmul.f32 %v534_v25, %v281_v34  ;;  %vm244_vm15 = vcmp.gt.f32.partialorder %v194_v32, 0.0  ;;  %v260_v39 = vmul.f32 0.2, %v194_v32 }
  0xe1   :  { %341 = vst.msk [vmem:[%s656_s3 + $0x68] sm:$0xff] %vm327_vm4, %v324_v30  ;;  %v229_v40 = vadd.f32 %v527_v20, %v228_v28  ;;  %v315_v41 = vadd.f32 %v541_v35, %v294_v33  ;;  %vm252_vm0 = vcmp.gt.f32.partialorder %v234_v36, 0.0  ;;  %v268_v42 = vmul.f32 0.2, %v234_v36 }
  0xe2   :  { %vm243_vm1 = vcmp.gt.f32.partialorder %v189_v37, 0.0  ;;  %v323_v43 = vadd.f32 %v541_v35, %v302_v38  ;;  %v276_v44 = vsel %vm244_vm15, %v194_v32, %v260_v39  ;;  %v259_v45 = vmul.f32 0.2, %v189_v37 }
  0xe3   :  { %vm251_vm2 = vcmp.gt.f32.partialorder %v229_v40, 0.0  ;;  %332 = vst.msk [vmem:[%s656_s3 + $0x20] sm:$0xff] %vm327_vm4, %v315_v41  ;;  %v297_v46 = vmul.f32 %v534_v25, %v276_v44  ;;  %v284_v47 = vsel %vm252_vm0, %v234_v36, %v268_v42  ;;  %v267_v48 = vmul.f32 0.2, %v229_v40 }
  0xe4   :  { %340 = vst.msk [vmem:[%s656_s3 + $0x60] sm:$0xff] %vm327_vm4, %v323_v43  ;;  %v305_v20 = vmul.f32 %v534_v25, %v284_v47  ;;  %v275_v49 = vsel %vm243_vm1, %v189_v37, %v259_v45 }
  0xe5   :  { %v318_v50 = vadd.f32 %v541_v35, %v297_v46  ;;  %v296_v51 = vmul.f32 %v534_v25, %v275_v49  ;;  %v283_v52 = vsel %vm251_vm2, %v229_v40, %v267_v48 }
  0xe6   :  { %v326_v53 = vadd.f32 %v541_v35, %v305_v20  ;;  %v304_v54 = vmul.f32 %v534_v25, %v283_v52 }
  0xe7   :  { %335 = vst.msk [vmem:[%s656_s3 + $0x38] sm:$0xff] %vm327_vm4, %v318_v50  ;;  %v317_v55 = vadd.f32 %v541_v35, %v296_v51 }
  0xe8   :  { %343 = vst.msk [vmem:[%s656_s3 + $0x78] sm:$0xff] %vm327_vm4, %v326_v53  ;;  %v325_v56 = vadd.f32 %v541_v35, %v304_v54 }
  0xe9   :  { %334 = vst.msk [vmem:[%s656_s3 + $0x30] sm:$0xff] %vm327_vm4, %v317_v55 }
  0xea   :  { %342 = vst.msk [vmem:[%s656_s3 + $0x70] sm:$0xff] %vm327_vm4, %v325_v56 }

// kernel: discriminator_forward.6
= control target key start
LH: loop header
LB: loop body
LE: loop exit
PB: predicated region body
PF: predicated region fallthrough
CT: control target
= control target key end

     0   :  { %v226_v0 = vmov 0.0   ;;  %vm45_vm0 = vcmask 130048   ;;  %vm173_vm3 = vcmask 261120   ;;  %s386_s1 = inlined_call_operand.vmem [shape: f32[144,32], index: 1, kind: input, shape index: {}]   ;;  %s387_s0 = inlined_call_operand.vmem [shape: f32[32,144], index: 0, kind: input, shape index: {}]   ;;  %s388_s2 = inlined_call_operand.vmem [shape: f32[3,32], index: 2, kind: input, shape index: {}]   ;;  %s389_s3 = inlined_call_operand.vmem [shape: f32[32,32], index: 3, kind: output, shape index: {}]  }
   0x1   :  { %58 = vmatprep.subr.mxu0 %v226_v0  ;;  %189 = vmatprep.subr.mxu1 %v226_v0  ;;  %v37_v1 = vld [vmem:[%s386_s1 + $0x78] sm:$0xff]  ;;  %v36_v2 = vld [vmem:[%s386_s1 + $0x70] sm:$0xff]  ;;  %v35_v3 = vld [vmem:[%s386_s1 + $0x68] sm:$0xff] }
   0x2   :  { %59 = vmatpush1.msra.mxu0 %v37_v1  ;;  %207 = vmatpush1.msra.mxu1 %v37_v1  ;;  %v34_v4 = vld [vmem:[%s386_s1 + $0x60] sm:$0xff]  ;;  %v33_v5 = vld [vmem:[%s386_s1 + $0x58] sm:$0xff]  ;;  %v32_v6 = vld [vmem:[%s386_s1 + $0x50] sm:$0xff] }
   0x3   :  { %60 = vmatprep.subr.mxu0 %v226_v0  ;;  %190 = vmatprep.subr.mxu1 %v226_v0  ;;  %v31_v7 = vld [vmem:[%s386_s1 + $0x48] sm:$0xff]  ;;  %v30_v8 = vld [vmem:[%s386_s1 + $0x40] sm:$0xff]  ;;  %v29_v9 = vld [vmem:[%s386_s1 + $0x38] sm:$0xff] }
   0x4   :  { %61 = vmatpush1.msra.mxu0 %v36_v2  ;;  %208 = vmatpush1.msra.mxu1 %v36_v2  ;;  %v28_v10 = vld [vmem:[%s386_s1 + $0x30] sm:$0xff]  ;;  %v27_v11 = vld [vmem:[%s386_s1 + $0x28] sm:$0xff]  ;;  %v26_v12 = vld [vmem:[%s386_s1 + $0x20] sm:$0xff] }
   0x5   :  { %62 = vmatprep.subr.mxu0 %v226_v0  ;;  %191 = vmatprep.subr.mxu1 %v226_v0  ;;  %v25_v13 = vld [vmem:[%s386_s1 + $0x18] sm:$0xff]  ;;  %v24_v14 = vld [vmem:[%s386_s1 + $0x10] sm:$0xff]  ;;  %v23_v15 = vld [vmem:[%s386_s1 + $0x8] sm:$0xff] }
   0x6   :  { %63 = vmatpush1.msra.mxu0 %v35_v3  ;;  %209 = vmatpush1.msra.mxu1 %v35_v3  ;;  %v22_v16 = vld [vmem:[%s386_s1] sm:$0xff]  ;;  %v39_v17 = vld [vmem:[%s386_s1 + $0x88] sm:$0xff]  ;;  %v17_v23 = vld [vmem:[%s387_s0 + $0x18] sm:$0xff] }
   0x7   :  { %64 = vmatprep.subr.mxu0 %v226_v0  ;;  %192 = vmatprep.subr.mxu1 %v226_v0  ;;  %v38_v18 = vld [vmem:[%s386_s1 + $0x80] sm:$0xff]  ;;  %v15_v19 = vld [vmem:[%s387_s0 + $0x8] sm:$0xff]  ;;  %v21_v24 = vld [vmem:[%s387_s0 + $0x38] sm:$0xff] }
   0x8   :  { %65 = vmatpush1.msra.mxu0 %v34_v4  ;;  %210 = vmatpush1.msra.mxu1 %v34_v4  ;;  %v19_v20 = vld [vmem:[%s387_s0 + $0x28] sm:$0xff]  ;;  %v14_v21 = vld [vmem:[%s387_s0] sm:$0xff]  ;;  %v16_v25 = vld [vmem:[%s387_s0 + $0x10] sm:$0xff] }
   0x9   :  { %66 = vmatprep.subr.mxu0 %v226_v0  ;;  %193 = vmatprep.subr.mxu1 %v226_v0  ;;  %v18_v22 = vld [vmem:[%s387_s0 + $0x20] sm:$0xff]  ;;  %v20_v26 = vld [vmem:[%s387_s0 + $0x30] sm:$0xff] }
   0xa   :  { %67 = vmatpush1.msra.mxu0 %v33_v5  ;;  %211 = vmatpush1.msra.mxu1 %v33_v5  ;;  %v182_v27 = vld [vmem:[%s388_s2] ss:$0 sm:$0xff]  ;;  %v187_v32 = vld [vmem:[%s388_s2 + $0x1] ss:$0 sm:$0xff]  ;;  %v188_v40 = vld [vmem:[%s388_s2 + $0x2] ss:$0 sm:$0xff] }
   0xb   :  { %68 = vmatprep.subr.mxu0 %v226_v0  ;;  %194 = vmatprep.subr.mxu1 %v226_v0 }
   0xc   :  { %69 = vmatpush1.msra.mxu0 %v32_v6  ;;  %212 = vmatpush1.msra.mxu1 %v32_v6 }
   0xd   :  { %70 = vmatprep.subr.mxu0 %v226_v0  ;;  %195 = vmatprep.subr.mxu1 %v226_v0 }
   0xe   :  { %71 = vmatpush1.msra.mxu0 %v31_v7  ;;  %213 = vmatpush1.msra.mxu1 %v31_v7 }
   0xf   :  { %72 = vmatprep.subr.mxu0 %v226_v0  ;;  %196 = vmatprep.subr.mxu1 %v226_v0 }
  0x10   :  { %73 = vmatpush1.msra.mxu0 %v30_v8  ;;  %214 = vmatpush1.msra.mxu1 %v30_v8 }
  0x11   :  { %74 = vmatprep.subr.mxu0 %v226_v0  ;;  %197 = vmatprep.subr.mxu1 %v226_v0 }
  0x12   :  { %75 = vmatpush1.msra.mxu0 %v29_v9  ;;  %215 = vmatpush1.msra.mxu1 %v29_v9 }
  0x13   :  { %76 = vmatprep.subr.mxu0 %v226_v0  ;;  %198 = vmatprep.subr.mxu1 %v226_v0 }
  0x14   :  { %77 = vmatpush1.msra.mxu0 %v28_v10  ;;  %216 = vmatpush1.msra.mxu1 %v28_v10 }
  0x15   :  { %78 = vmatprep.subr.mxu0 %v226_v0  ;;  %199 = vmatprep.subr.mxu1 %v226_v0 }
  0x16   :  { %79 = vmatpush1.msra.mxu0 %v27_v11  ;;  %217 = vmatpush1.msra.mxu1 %v27_v11 }
  0x17   :  { %80 = vmatprep.subr.mxu0 %v226_v0  ;;  %200 = vmatprep.subr.mxu1 %v226_v0 }
  0x18   :  { %81 = vmatpush1.msra.mxu0 %v26_v12  ;;  %218 = vmatpush1.msra.mxu1 %v26_v12 }
  0x19   :  { %82 = vmatprep.subr.mxu0 %v226_v0  ;;  %201 = vmatprep.subr.mxu1 %v226_v0 }
  0x1a   :  { %83 = vmatpush1.msra.mxu0 %v25_v13  ;;  %219 = vmatpush1.msra.mxu1 %v25_v13 }
  0x1b   :  { %84 = vmatprep.subr.mxu0 %v226_v0  ;;  %202 = vmatprep.subr.mxu1 %v226_v0 }
  0x1c   :  { %85 = vmatpush1.msra.mxu0 %v24_v14  ;;  %220 = vmatpush1.msra.mxu1 %v24_v14 }
  0x1d   :  { %86 = vmatprep.subr.mxu0 %v226_v0  ;;  %203 = vmatprep.subr.mxu1 %v226_v0 }
  0x1e   :  { %87 = vmatpush1.msra.mxu0 %v23_v15  ;;  %221 = vmatpush1.msra.mxu1 %v23_v15 }
  0x1f   :  { %88 = vmatprep.subr.mxu0 %v226_v0  ;;  %204 = vmatprep.subr.mxu1 %v226_v0 }
  0x20   :  { %89 = vmatpush1.msra.mxu0 %v22_v16  ;;  %222 = vmatpush1.msra.mxu1 %v22_v16 }
  0x21   :  { %118 = vmatprep.subr.mxu0 %v226_v0  ;;  %205 = vmatprep.subr.mxu1 %v226_v0 }
  0x22   :  { %119 = vmatpush2.msra.mxu0 %v39_v17  ;;  %223 = vmatpush2.msra.mxu1 %v39_v17 }
  0x23   :  { %120 = vmatprep.subr.mxu0 %v226_v0  ;;  %206 = vmatprep.subr.mxu1 %v226_v0 }
  0x24   :  { %121 = vmatpush2.msra.mxu0 %v38_v18  ;;  %224 = vmatpush2.msra.mxu1 %v38_v18 }
  0x25   :  { %183 = vmatprep.mubr.msk.f32.mxu0 %vm45_vm0, %v15_v19  ;;  %185 = vmatprep.mubr.msk.f32.mxu1 %vm45_vm0, %v19_v20 }
  0x26   :  { %123 = vmatmul.mubr.f32.vlgmr.msra.gmra.mxu0 %v14_v21  ;;  %133 = vmatmul.mubr.f32.vlgmr.msra.gmra.mxu1 %v18_v22 }
  0x27   :  { %184 = vmatprep.mubr.msk.f32.mxu0 %vm45_vm0, %v17_v23  ;;  %186 = vmatprep.mubr.msk.f32.mxu1 %vm45_vm0, %v21_v24 }
  0x2a   :  { %128 = vmatmul.mubr.f32.gmra.mxu0 %v16_v25  ;;  %138 = vmatmul.mubr.f32.gmra.mxu1 %v20_v26 }
  0xe6   :  { %v124_v28 = vpop.f32.mrf.mxu0  ;;  %v134_v29 = vpop.f32.mrf.mxu1 }
  0xe7   :  { %v125_v30 = vadd.f32 %v182_v27, %v124_v28  ;;  %v135_v31 = vadd.f32 %v182_v27, %v134_v29 }
  0xe8   :  { %v126_v33 = vpop.f32.mrf.mxu0  ;;  %v136_v34 = vpop.f32.mrf.mxu1 }
  0xe9   :  { %vm143_vm1 = vcmp.gt.f32.partialorder %v125_v30, 0.0  ;;  %v147_v35 = vmul.f32 0.2, %v125_v30  ;;  %vm145_vm2 = vcmp.gt.f32.partialorder %v135_v31, 0.0  ;;  %v149_v36 = vmul.f32 0.2, %v135_v31 }
  0xea   :  { %v129_v37 = vpop.f32.mrf.mxu0  ;;  %v139_v38 = vpop.f32.mrf.mxu1 }
  0xeb   :  { %v151_v39 = vsel %vm143_vm1, %v125_v30, %v147_v35  ;;  %v153_v41 = vsel %vm145_vm2, %v135_v31, %v149_v36  ;;  %v130_v42 = vadd.f32 %v182_v27, %v129_v37  ;;  %v140_v43 = vadd.f32 %v182_v27, %v139_v38 }
  0xec   :  { %v160_v44 = vmul.f32 %v187_v32, %v151_v39  ;;  %v162_v45 = vmul.f32 %v187_v32, %v153_v41  ;;  %v131_v46 = vpop.f32.mrf.mxu0  ;;  %v141_v47 = vpop.f32.mrf.mxu1 }
  0xed   :  { %vm144_vm4 = vcmp.gt.f32.partialorder %v130_v42, 0.0  ;;  %v148_v48 = vmul.f32 0.2, %v130_v42  ;;  %vm146_vm5 = vcmp.gt.f32.partialorder %v140_v43, 0.0  ;;  %v150_v49 = vmul.f32 0.2, %v140_v43 }
  0xee   :  { %v169_v50 = vadd.f32 %v188_v40, %v160_v44  ;;  %v171_v51 = vadd.f32 %v188_v40, %v162_v45 }
  0xef   :  { %v152_v52 = vsel %vm144_vm4, %v130_v42, %v148_v48  ;;  %v154_v53 = vsel %vm146_vm5, %v140_v43, %v150_v49 }
  0xf0   :  { %174 = vst.msk [vmem:[%s389_s3] sm:$0xff] %vm173_vm3, %v169_v50  ;;  %176 = vst.msk [vmem:[%s389_s3 + $0x10] sm:$0xff] %vm173_vm3, %v171_v51  ;;  %v161_v54 = vmul.f32 %v187_v32, %v152_v52  ;;  %v163_v55 = vmul.f32 %v187_v32, %v154_v53 }
  0xf2   :  { %v170_v56 = vadd.f32 %v188_v40, %v161_v54  ;;  %v172_v57 = vadd.f32 %v188_v40, %v163_v55 }
  0xf4   :  { %175 = vst.msk [vmem:[%s389_s3 + $0x8] sm:$0xff] %vm173_vm3, %v170_v56  ;;  %177 = vst.msk [vmem:[%s389_s3 + $0x18] sm:$0xff] %vm173_vm3, %v172_v57 }

// kernel: discriminator_forward.7
= control target key start
LH: loop header
LB: loop body
LE: loop exit
PB: predicated region body
PF: predicated region fallthrough
CT: control target
= control target key end

     0   :  { %v280_v3 = vmov 0.0   ;;  %vm281_vm0 = vmmov 0   ;;  %vm58_vm1 = vcmask 261120   ;;  %vm217_vm3 = vcmask 523264   ;;  %s431_s1 = inlined_call_operand.vmem [shape: f32[288,64], index: 1, kind: input, shape index: {}]   ;;  %s432_s0 = inlined_call_operand.vmem [shape: f32[8,288], index: 0, kind: input, shape index: {}]   ;;  %s433_s2 = inlined_call_operand.vmem [shape: f32[3,64], index: 2, kind: input, shape index: {}]   ;;  %s434_s3 = inlined_call_operand.vmem [shape: f32[8,64], index: 3, kind: output, shape index: {}]  }
   0x1   :  { %v48_v0 = vld [vmem:[%s431_s1 + $0xf8] sm:$0xff]  ;;  %v47_v2 = vld [vmem:[%s431_s1 + $0xf0] sm:$0xff]  ;;  %267 = vmatprep.subr.mxu1 %v280_v3  ;;  %275 = vmatprep.mubr.msk.f32.mxu1 %vm281_vm0, %v280_v3  ;;  %v46_v5 = vld [vmem:[%s431_s1 + $0xe8] sm:$0xff] }
   0x2   :  { %v32_v1 = vld [vmem:[%s431_s1 + $0x78] sm:$0xff]  ;;  %227 = vmatprep.subr.mxu0 %v48_v0  ;;  %v31_v4 = vld [vmem:[%s431_s1 + $0x70] sm:$0xff]  ;;  %v30_v6 = vld [vmem:[%s431_s1 + $0x68] sm:$0xff] }
   0x3   :  { %228 = vmatpush3.msra.mxu0 %v32_v1  ;;  %v45_v7 = vld [vmem:[%s431_s1 + $0xe0] sm:$0xff]  ;;  %v44_v9 = vld [vmem:[%s431_s1 + $0xd8] sm:$0xff]  ;;  %v43_v11 = vld [vmem:[%s431_s1 + $0xd0] sm:$0xff] }
   0x4   :  { %229 = vmatprep.subr.mxu0 %v47_v2  ;;  %v29_v8 = vld [vmem:[%s431_s1 + $0x60] sm:$0xff]  ;;  %v28_v10 = vld [vmem:[%s431_s1 + $0x58] sm:$0xff]  ;;  %v27_v12 = vld [vmem:[%s431_s1 + $0x50] sm:$0xff] }
   0x5   :  { %230 = vmatpush3.msra.mxu0 %v31_v4  ;;  %v42_v13 = vld [vmem:[%s431_s1 + $0xc8] sm:$0xff]  ;;  %v52_v14 = vld [vmem:[%s431_s1 + $0x118] sm:$0xff]  ;;  %v51_v17 = vld [vmem:[%s431_s1 + $0x110] sm:$0xff] }
   0x6   :  { %231 = vmatprep.subr.mxu0 %v46_v5  ;;  %v26_v15 = vld [vmem:[%s431_s1 + $0x48] sm:$0xff]  ;;  %268 = vmatpush3.msra.mxu1 %v52_v14  ;;  %v41_v18 = vld [vmem:[%s431_s1 + $0xc0] sm:$0xff]  ;;  %v40_v21 = vld [vmem:[%s431_s1 + $0xb8] sm:$0xff] }
   0x7   :  { %232 = vmatpush3.msra.mxu0 %v30_v6  ;;  %v15_v16 = vld [vmem:[%s432_s0 + $0x8] sm:$0xff]  ;;  %269 = vmatprep.subr.mxu1 %v280_v3  ;;  %v25_v19 = vld [vmem:[%s431_s1 + $0x40] sm:$0xff]  ;;  %v24_v22 = vld [vmem:[%s431_s1 + $0x38] sm:$0xff] }
   0x8   :  { %233 = vmatprep.subr.mxu0 %v45_v7  ;;  %126 = vmatprep.mubr.f32.mxu0 %v15_v16  ;;  %v50_v20 = vld [vmem:[%s431_s1 + $0x108] sm:$0xff]  ;;  %v49_v23 = vld [vmem:[%s431_s1 + $0x100] sm:$0xff]  ;;  %v39_v24 = vld [vmem:[%s431_s1 + $0xb0] sm:$0xff] }
   0x9   :  { %234 = vmatpush3.msra.mxu0 %v29_v8  ;;  %270 = vmatpush3.msra.mxu1 %v51_v17  ;;  %v16_v25 = vld [vmem:[%s432_s0 + $0x10] sm:$0xff]  ;;  %v38_v27 = vld [vmem:[%s431_s1 + $0xa8] sm:$0xff]  ;;  %v37_v29 = vld [vmem:[%s431_s1 + $0xa0] sm:$0xff] }
   0xa   :  { %235 = vmatprep.subr.mxu0 %v44_v9  ;;  %271 = vmatprep.subr.mxu1 %v280_v3  ;;  %v23_v26 = vld [vmem:[%s431_s1 + $0x30] sm:$0xff]  ;;  %v22_v28 = vld [vmem:[%s431_s1 + $0x28] sm:$0xff]  ;;  %v21_v30 = vld [vmem:[%s431_s1 + $0x20] sm:$0xff] }
   0xb   :  { %236 = vmatpush3.msra.mxu0 %v28_v10  ;;  %272 = vmatpush3.msra.mxu1 %v50_v20  ;;  %v36_v31 = vld [vmem:[%s431_s1 + $0x98] sm:$0xff]  ;;  %v35_v33 = vld [vmem:[%s431_s1 + $0x90] sm:$0xff]  ;;  %v34_v35 = vld [vmem:[%s431_s1 + $0x88] sm:$0xff] }
   0xc   :  { %237 = vmatprep.subr.mxu0 %v43_v11  ;;  %273 = vmatprep.subr.mxu1 %v280_v3  ;;  %v20_v32 = vld [vmem:[%s431_s1 + $0x18] sm:$0xff]  ;;  %v19_v34 = vld [vmem:[%s431_s1 + $0x10] sm:$0xff]  ;;  %v18_v36 = vld [vmem:[%s431_s1 + $0x8] sm:$0xff] }
   0xd   :  { %238 = vmatpush3.msra.mxu0 %v27_v12  ;;  %274 = vmatpush3.msra.mxu1 %v49_v23  ;;  %v33_v37 = vld [vmem:[%s431_s1 + $0x80] sm:$0xff] }
   0xe   :  { %239 = vmatprep.subr.mxu0 %v42_v13  ;;  %276 = vmatmul.mubr.msk.f32.vlgmr.msra.gmra.mxu1 %vm58_vm1, %v16_v25  ;;  %v17_v38 = vld [vmem:[%s431_s1] sm:$0xff] }
   0xf   :  { %240 = vmatpush3.msra.mxu0 %v26_v15  ;;  %v14_v39 = vld [vmem:[%s432_s0] sm:$0xff] }
  0x10   :  { %241 = vmatprep.subr.mxu0 %v41_v18  ;;  %v223_v44 = vld [vmem:[%s433_s2] ss:$0 sm:$0xff]  ;;  %v225_v49 = vld [vmem:[%s433_s2 + $0x1] ss:$0 sm:$0xff]  ;;  %v226_v51 = vld [vmem:[%s433_s2 + $0x2] ss:$0 sm:$0xff] }
  0x11   :  { %242 = vmatpush3.msra.mxu0 %v25_v19 }
  0x12   :  { %243 = vmatprep.subr.mxu0 %v40_v21 }
  0x13   :  { %244 = vmatpush3.msra.mxu0 %v24_v22 }
  0x14   :  { %245 = vmatprep.subr.mxu0 %v39_v24 }
  0x15   :  { %246 = vmatpush3.msra.mxu0 %v23_v26 }
  0x16   :  { %247 = vmatprep.subr.mxu0 %v38_v27 }
  0x17   :  { %248 = vmatpush3.msra.mxu0 %v22_v28 }
  0x18   :  { %249 = vmatprep.subr.mxu0 %v37_v29 }
  0x19   :  { %250 = vmatpush3.msra.mxu0 %v21_v30 }
  0x1a   :  { %251 = vmatprep.subr.mxu0 %v36_v31 }
  0x1b   :  { %252 = vmatpush3.msra.mxu0 %v20_v32 }
  0x1c   :  { %253 = vmatprep.subr.mxu0 %v35_v33 }
  0x1d   :  { %254 = vmatpush3.msra.mxu0 %v19_v34 }
  0x1e   :  { %255 = vmatprep.subr.mxu0 %v34_v35 }
  0x1f   :  { %256 = vmatpush3.msra.mxu0 %v18_v36 }
  0x20   :  { %257 = vmatprep.subr.mxu0 %v33_v37 }
  0x21   :  { %258 = vmatpush3.msra.mxu0 %v17_v38 }
  0x22   :  { %127 = vmatmul.mubr.f32.vlgmr.msra.gmra.mxu0 %v14_v39 }
  0xce   :  { %v198_v40 = vpop.f32.mrf.mxu1 }
  0xd0   :  { %v277_v41 = vpop.f32.mrf.mxu1 }
  0xe2   :  { %v259_v42 = vpop.f32.mrf.mxu0 }
  0xe4   :  { %v260_v43 = vpop.f32.mrf.mxu0 }
  0xe5   :  { %v261_v45 = vadd.f32 %v260_v43, %v259_v42 }
  0xe7   :  { %v129_v46 = vadd.f32 %v261_v45, %v223_v44 }
  0xe9   :  { %v199_v47 = vadd.f32 %v198_v40, %v129_v46 }
  0xeb   :  { %vm202_vm2 = vcmp.gt.f32.partialorder %v199_v47, 0.0  ;;  %v203_v48 = vmul.f32 0.2, %v199_v47 }
  0xed   :  { %v204_v50 = vsel %vm202_vm2, %v199_v47, %v203_v48 }
  0xee   :  { %v210_v52 = vmul.f32 %v225_v49, %v204_v50 }
  0xf0   :  { %v216_v53 = vadd.f32 %v226_v51, %v210_v52 }
  0xf2   :  { %218 = vst.msk [vmem:[%s434_s3] sm:$0xff] %vm217_vm3, %v216_v53 }

// kernel: discriminator_forward.8
= control target key start
LH: loop header
LB: loop body
LE: loop exit
PB: predicated region body
PF: predicated region fallthrough
CT: control target
= control target key end

     0   :  { %vm435_vm0 = vmmov 0   ;;  %vm96_vm1 = vcmask 523264   ;;  %s699_s1 = inlined_call_operand.vmem [shape: f32[576,128], index: 1, kind: input, shape index: {}]   ;;  %s700_s0 = inlined_call_operand.vmem [shape: f32[8,576], index: 0, kind: input, shape index: {}]   ;;  %s701_s2 = inlined_call_operand.vmem [shape: f32[3,128], index: 2, kind: input, shape index: {}]   ;;  %s702_s3 = inlined_call_operand.vmem [shape: f32[8,128], index: 3, kind: output, shape index: {}]  }
   0x1   :  { %v50_v0 = vld [vmem:[%s699_s1 + $0xf8] sm:$0xff]  ;;  %v49_v2 = vld [vmem:[%s699_s1 + $0xf0] sm:$0xff]  ;;  %v48_v6 = vld [vmem:[%s699_s1 + $0xe8] sm:$0xff] }
   0x2   :  { %v34_v1 = vld [vmem:[%s699_s1 + $0x78] sm:$0xff]  ;;  %334 = vmatprep.subr.mxu0 %v50_v0  ;;  %v33_v4 = vld [vmem:[%s699_s1 + $0x70] sm:$0xff]  ;;  %v32_v8 = vld [vmem:[%s699_s1 + $0x68] sm:$0xff] }
   0x3   :  { %v82_v3 = vld [vmem:[%s699_s1 + $0x1f8] sm:$0xff]  ;;  %335 = vmatpush3.msra.mxu0 %v34_v1  ;;  %v81_v7 = vld [vmem:[%s699_s1 + $0x1f0] sm:$0xff]  ;;  %v80_v10 = vld [vmem:[%s699_s1 + $0x1e8] sm:$0xff] }
   0x4   :  { %v66_v5 = vld [vmem:[%s699_s1 + $0x178] sm:$0xff]  ;;  %369 = vmatprep.subr.mxu1 %v82_v3  ;;  %336 = vmatprep.subr.mxu0 %v49_v2  ;;  %v65_v9 = vld [vmem:[%s699_s1 + $0x170] sm:$0xff]  ;;  %v47_v11 = vld [vmem:[%s699_s1 + $0xe0] sm:$0xff] }
   0x5   :  { %370 = vmatpush3.msra.mxu1 %v66_v5  ;;  %337 = vmatpush3.msra.mxu0 %v33_v4  ;;  %v64_v12 = vld [vmem:[%s699_s1 + $0x168] sm:$0xff]  ;;  %v31_v13 = vld [vmem:[%s699_s1 + $0x60] sm:$0xff]  ;;  %v46_v15 = vld [vmem:[%s699_s1 + $0xd8] sm:$0xff]  ;;  %v434_v5 = vmov 0.0  }
   0x6   :  { %371 = vmatprep.subr.mxu1 %v81_v7  ;;  %338 = vmatprep.subr.mxu0 %v48_v6  ;;  %v79_v14 = vld [vmem:[%s699_s1 + $0x1e0] sm:$0xff]  ;;  %v30_v17 = vld [vmem:[%s699_s1 + $0x58] sm:$0xff]  ;;  %v45_v19 = vld [vmem:[%s699_s1 + $0xd0] sm:$0xff] }
   0x7   :  { %372 = vmatpush3.msra.mxu1 %v65_v9  ;;  %339 = vmatpush3.msra.mxu0 %v32_v8  ;;  %v63_v16 = vld [vmem:[%s699_s1 + $0x160] sm:$0xff]  ;;  %v78_v18 = vld [vmem:[%s699_s1 + $0x1d8] sm:$0xff]  ;;  %v29_v21 = vld [vmem:[%s699_s1 + $0x50] sm:$0xff] }
   0x8   :  { %373 = vmatprep.subr.mxu1 %v80_v10  ;;  %340 = vmatprep.subr.mxu0 %v47_v11  ;;  %v62_v20 = vld [vmem:[%s699_s1 + $0x158] sm:$0xff]  ;;  %v77_v22 = vld [vmem:[%s699_s1 + $0x1d0] sm:$0xff]  ;;  %v44_v23 = vld [vmem:[%s699_s1 + $0xc8] sm:$0xff] }
   0x9   :  { %374 = vmatpush3.msra.mxu1 %v64_v12  ;;  %341 = vmatpush3.msra.mxu0 %v31_v13  ;;  %v61_v24 = vld [vmem:[%s699_s1 + $0x150] sm:$0xff]  ;;  %v28_v25 = vld [vmem:[%s699_s1 + $0x48] sm:$0xff]  ;;  %v43_v27 = vld [vmem:[%s699_s1 + $0xc0] sm:$0xff] }
   0xa   :  { %375 = vmatprep.subr.mxu1 %v79_v14  ;;  %342 = vmatprep.subr.mxu0 %v46_v15  ;;  %v76_v26 = vld [vmem:[%s699_s1 + $0x1c8] sm:$0xff]  ;;  %v27_v29 = vld [vmem:[%s699_s1 + $0x40] sm:$0xff]  ;;  %v42_v31 = vld [vmem:[%s699_s1 + $0xb8] sm:$0xff] }
   0xb   :  { %376 = vmatpush3.msra.mxu1 %v63_v16  ;;  %343 = vmatpush3.msra.mxu0 %v30_v17  ;;  %v60_v28 = vld [vmem:[%s699_s1 + $0x148] sm:$0xff]  ;;  %v75_v30 = vld [vmem:[%s699_s1 + $0x1c0] sm:$0xff]  ;;  %v26_v33 = vld [vmem:[%s699_s1 + $0x38] sm:$0xff] }
   0xc   :  { %377 = vmatprep.subr.mxu1 %v78_v18  ;;  %344 = vmatprep.subr.mxu0 %v45_v19  ;;  %v59_v32 = vld [vmem:[%s699_s1 + $0x140] sm:$0xff]  ;;  %v74_v34 = vld [vmem:[%s699_s1 + $0x1b8] sm:$0xff]  ;;  %v41_v35 = vld [vmem:[%s699_s1 + $0xb0] sm:$0xff] }
   0xd   :  { %378 = vmatpush3.msra.mxu1 %v62_v20  ;;  %345 = vmatpush3.msra.mxu0 %v29_v21  ;;  %v58_v36 = vld [vmem:[%s699_s1 + $0x138] sm:$0xff]  ;;  %v25_v37 = vld [vmem:[%s699_s1 + $0x30] sm:$0xff]  ;;  %v40_v39 = vld [vmem:[%s699_s1 + $0xa8] sm:$0xff] }
   0xe   :  { %379 = vmatprep.subr.mxu1 %v77_v22  ;;  %346 = vmatprep.subr.mxu0 %v44_v23  ;;  %v73_v38 = vld [vmem:[%s699_s1 + $0x1b0] sm:$0xff]  ;;  %v24_v41 = vld [vmem:[%s699_s1 + $0x28] sm:$0xff]  ;;  %v39_v43 = vld [vmem:[%s699_s1 + $0xa0] sm:$0xff] }
   0xf   :  { %380 = vmatpush3.msra.mxu1 %v61_v24  ;;  %347 = vmatpush3.msra.mxu0 %v28_v25  ;;  %v57_v40 = vld [vmem:[%s699_s1 + $0x130] sm:$0xff]  ;;  %v72_v42 = vld [vmem:[%s699_s1 + $0x1a8] sm:$0xff]  ;;  %v23_v45 = vld [vmem:[%s699_s1 + $0x20] sm:$0xff] }
  0x10   :  { %381 = vmatprep.subr.mxu1 %v76_v26  ;;  %348 = vmatprep.subr.mxu0 %v43_v27  ;;  %v56_v44 = vld [vmem:[%s699_s1 + $0x128] sm:$0xff]  ;;  %v71_v46 = vld [vmem:[%s699_s1 + $0x1a0] sm:$0xff]  ;;  %v38_v47 = vld [vmem:[%s699_s1 + $0x98] sm:$0xff] }
  0x11   :  { %382 = vmatpush3.msra.mxu1 %v60_v28  ;;  %349 = vmatpush3.msra.mxu0 %v27_v29  ;;  %v55_v48 = vld [vmem:[%s699_s1 + $0x120] sm:$0xff]  ;;  %v22_v49 = vld [vmem:[%s699_s1 + $0x18] sm:$0xff]  ;;  %v37_v51 = vld [vmem:[%s699_s1 + $0x90] sm:$0xff] }
  0x12   :  { %383 = vmatprep.subr.mxu1 %v75_v30  ;;  %350 = vmatprep.subr.mxu0 %v42_v31  ;;  %v70_v50 = vld [vmem:[%s699_s1 + $0x198] sm:$0xff]  ;;  %v21_v53 = vld [vmem:[%s699_s1 + $0x10] sm:$0xff]  ;;  %v36_v55 = vld [vmem:[%s699_s1 + $0x88] sm:$0xff] }
  0x13   :  { %384 = vmatpush3.msra.mxu1 %v59_v32  ;;  %351 = vmatpush3.msra.mxu0 %v26_v33  ;;  %v54_v52 = vld [vmem:[%s699_s1 + $0x118] sm:$0xff]  ;;  %v69_v54 = vld [vmem:[%s699_s1 + $0x190] sm:$0xff]  ;;  %v20_v57 = vld [vmem:[%s699_s1 + $0x8] sm:$0xff] }
  0x14   :  { %385 = vmatprep.subr.mxu1 %v74_v34  ;;  %352 = vmatprep.subr.mxu0 %v41_v35  ;;  %v53_v56 = vld [vmem:[%s699_s1 + $0x110] sm:$0xff]  ;;  %v68_v58 = vld [vmem:[%s699_s1 + $0x188] sm:$0xff]  ;;  %v35_v59 = vld [vmem:[%s699_s1 + $0x80] sm:$0xff] }
  0x15   :  { %386 = vmatpush3.msra.mxu1 %v58_v36  ;;  %353 = vmatpush3.msra.mxu0 %v25_v37  ;;  %v15_v60 = vld [vmem:[%s700_s0 + $0x8] sm:$0xff]  ;;  %v19_v61 = vld [vmem:[%s699_s1] sm:$0xff]  ;;  %v17_v2 = vld [vmem:[%s700_s0 + $0x18] sm:$0xff] }
  0x16   :  { %387 = vmatprep.subr.mxu1 %v73_v38  ;;  %354 = vmatprep.subr.mxu0 %v40_v39  ;;  %v52_v62 = vld [vmem:[%s699_s1 + $0x108] sm:$0xff]  ;;  %v14_v63 = vld [vmem:[%s700_s0] sm:$0xff]  ;;  %v90_v3 = vld [vmem:[%s699_s1 + $0x238] sm:$0xff] }
  0x17   :  { %388 = vmatpush3.msra.mxu1 %v57_v40  ;;  %355 = vmatpush3.msra.mxu0 %v24_v41  ;;  %v67_v0 = vld [vmem:[%s699_s1 + $0x180] sm:$0xff]  ;;  %v16_v4 = vld [vmem:[%s700_s0 + $0x10] sm:$0xff]  ;;  %v88_v7 = vld [vmem:[%s699_s1 + $0x228] sm:$0xff] }
  0x18   :  { %389 = vmatprep.subr.mxu1 %v72_v42  ;;  %356 = vmatprep.subr.mxu0 %v39_v43  ;;  %v51_v1 = vld [vmem:[%s699_s1 + $0x100] sm:$0xff]  ;;  %v89_v6 = vld [vmem:[%s699_s1 + $0x230] sm:$0xff]  ;;  %v86_v9 = vld [vmem:[%s699_s1 + $0x218] sm:$0xff] }
  0x19   :  { %390 = vmatpush3.msra.mxu1 %v56_v44  ;;  %357 = vmatpush3.msra.mxu0 %v23_v45  ;;  %v87_v8 = vld [vmem:[%s699_s1 + $0x220] sm:$0xff]  ;;  %v85_v10 = vld [vmem:[%s699_s1 + $0x210] sm:$0xff]  ;;  %v84_v11 = vld [vmem:[%s699_s1 + $0x208] sm:$0xff] }
  0x1a   :  { %391 = vmatprep.subr.mxu1 %v71_v46  ;;  %358 = vmatprep.subr.mxu0 %v38_v47  ;;  %v83_v12 = vld [vmem:[%s699_s1 + $0x200] sm:$0xff] }
  0x1b   :  { %392 = vmatpush3.msra.mxu1 %v55_v48  ;;  %359 = vmatpush3.msra.mxu0 %v22_v49  ;;  %v18_v13 = vld [vmem:[%s700_s0 + $0x20] sm:$0xff] }
  0x1c   :  { %393 = vmatprep.subr.mxu1 %v70_v50  ;;  %360 = vmatprep.subr.mxu0 %v37_v51  ;;  %v330_v18 = vld [vmem:[%s701_s2] ss:$0 sm:$0xff]  ;;  %v332_v27 = vld [vmem:[%s701_s2 + $0x1] ss:$0 sm:$0xff]  ;;  %v333_v28 = vld [vmem:[%s701_s2 + $0x2] ss:$0 sm:$0xff] }
  0x1d   :  { %394 = vmatpush3.msra.mxu1 %v54_v52  ;;  %361 = vmatpush3.msra.mxu0 %v21_v53 }
  0x1e   :  { %395 = vmatprep.subr.mxu1 %v69_v54  ;;  %362 = vmatprep.subr.mxu0 %v36_v55 }
  0x1f   :  { %396 = vmatpush3.msra.mxu1 %v53_v56  ;;  %363 = vmatpush3.msra.mxu0 %v20_v57 }
  0x20   :  { %397 = vmatprep.subr.mxu1 %v68_v58  ;;  %364 = vmatprep.subr.mxu0 %v35_v59 }
  0x21   :  { %164 = vmatprep.mubr.f32.mxu0 %v15_v60  ;;  %365 = vmatpush3.msra.mxu0 %v19_v61 }
  0x22   :  { %398 = vmatpush3.msra.mxu1 %v52_v62  ;;  %165 = vmatmul.mubr.f32.vlgmr.msra.gmra.mxu0 %v14_v63 }
  0x23   :  { %399 = vmatprep.subr.mxu1 %v67_v0  ;;  %413 = vmatprep.subr.mxu0 %v434_v5 }
  0x24   :  { %400 = vmatpush3.msra.mxu1 %v51_v1  ;;  %234 = vmatprep.mubr.f32.mxu1 %v17_v2 }
  0x25   :  { %414 = vmatpush3.msra.mxu0 %v90_v3  ;;  %235 = vmatmul.mubr.f32.vlgmr.msra.gmra.mxu1 %v16_v4 }
  0x26   :  { %415 = vmatprep.subr.mxu0 %v434_v5  ;;  %429 = vmatprep.mubr.msk.f32.mxu0 %vm435_vm0, %v434_v5 }
  0x27   :  { %416 = vmatpush3.msra.mxu0 %v89_v6 }
  0x28   :  { %417 = vmatprep.subr.mxu0 %v434_v5 }
  0x29   :  { %418 = vmatpush3.msra.mxu0 %v88_v7 }
  0x2a   :  { %419 = vmatprep.subr.mxu0 %v434_v5 }
  0x2b   :  { %420 = vmatpush3.msra.mxu0 %v87_v8 }
  0x2c   :  { %421 = vmatprep.subr.mxu0 %v434_v5 }
  0x2d   :  { %422 = vmatpush3.msra.mxu0 %v86_v9 }
  0x2e   :  { %423 = vmatprep.subr.mxu0 %v434_v5 }
  0x2f   :  { %424 = vmatpush3.msra.mxu0 %v85_v10 }
  0x30   :  { %425 = vmatprep.subr.mxu0 %v434_v5 }
  0x31   :  { %426 = vmatpush3.msra.mxu0 %v84_v11 }
  0x32   :  { %427 = vmatprep.subr.mxu0 %v434_v5 }
  0x33   :  { %428 = vmatpush3.msra.mxu0 %v83_v12 }
  0x34   :  { %430 = vmatmul.mubr.msk.f32.vlgmr.msra.gmra.mxu0 %vm96_vm1, %v18_v13 }
  0xe2   :  { %v366_v14 = vpop.f32.mrf.mxu0 }
  0xe4   :  { %v367_v15 = vpop.f32.mrf.mxu0 }
  0xe5   :  { %v401_v16 = vpop.f32.mrf.mxu1  ;;  %v368_v17 = vadd.f32 %v367_v15, %v366_v14 }
  0xe7   :  { %v402_v19 = vpop.f32.mrf.mxu1  ;;  %v167_v20 = vadd.f32 %v368_v17, %v330_v18 }
  0xe8   :  { %v403_v21 = vadd.f32 %v402_v19, %v401_v16 }
  0xea   :  { %v237_v22 = vadd.f32 %v403_v21, %v167_v20 }
  0xf4   :  { %v306_v23 = vpop.f32.mrf.mxu0 }
  0xf5   :  { %v307_v24 = vadd.f32 %v306_v23, %v237_v22 }
  0xf6   :  { %v431_v25 = vpop.f32.mrf.mxu0 }
  0xf7   :  { %vm310_vm2 = vcmp.gt.f32.partialorder %v307_v24, 0.0  ;;  %v311_v26 = vmul.f32 0.2, %v307_v24 }
  0xf9   :  { %v312_v29 = vsel %vm310_vm2, %v307_v24, %v311_v26 }
  0xfa   :  { %v318_v30 = vmul.f32 %v332_v27, %v312_v29 }
  0xfc   :  { %v324_v31 = vadd.f32 %v333_v28, %v318_v30 }
  0xfe   :  { %325 = vst [vmem:[%s702_s3] sm:$0xff] %v324_v31 }

// kernel: discriminator_forward.9
= control target key start
LH: loop header
LB: loop body
LE: loop exit
PB: predicated region body
PF: predicated region fallthrough
CT: control target
= control target key end

     0   :  { %v181_v0 = vmov 0.0   ;;  %vm182_vm0 = vmmov 0   ;;  %vm116_vm1 = vcmask 7168   ;;  %s260_s1 = inlined_call_operand.vmem [shape: f32[128,1], index: 1, kind: input, shape index: {}]   ;;  %s261_s2 = inlined_call_operand.<no memory space> [shape: f32[1,1], index: 2, kind: input, shape index: {}]   ;;  %s262_s0 = inlined_call_operand.vmem [shape: f32[8,128], index: 0, kind: input, shape index: {}]   ;;  %s263_s3 = inlined_call_operand.vmem [shape: f32[8,1], index: 3, kind: output, shape index: {}]  }
   0x1   :  { %140 = vmatprep.subr.mxu0 %v181_v0  ;;  %v32_v1 = vld [vmem:[%s260_s1 + $0x78] sm:$0xff]  ;;  %v31_v2 = vld [vmem:[%s260_s1 + $0x70] sm:$0xff]  ;;  %172 = vmatprep.mubr.msk.f32.mxu0 %vm182_vm0, %v181_v0  ;;  %v8_v3 = vstv %s261_s2  ;;  %v30_v4 = vld [vmem:[%s260_s1 + $0x68] sm:$0xff] }
   0x2   :  { %141 = vmatpush3.msra.mxu0 %v32_v1  ;;  %9 = vst [vmem:[#allocation2] sm:$0x1] %v8_v3  ;;  %v29_v5 = vld [vmem:[%s260_s1 + $0x60] sm:$0xff]  ;;  %v28_v6 = vld [vmem:[%s260_s1 + $0x58] sm:$0xff]  ;;  %v27_v7 = vld [vmem:[%s260_s1 + $0x50] sm:$0xff] }
   0x3   :  { %142 = vmatprep.subr.mxu0 %v181_v0  ;;  %v26_v8 = vld [vmem:[%s260_s1 + $0x48] sm:$0xff]  ;;  %v25_v9 = vld [vmem:[%s260_s1 + $0x40] sm:$0xff]  ;;  %v24_v10 = vld [vmem:[%s260_s1 + $0x38] sm:$0xff] }
   0x4   :  { %143 = vmatpush3.msra.mxu0 %v31_v2  ;;  %v23_v11 = vld [vmem:[%s260_s1 + $0x30] sm:$0xff]  ;;  %v22_v12 = vld [vmem:[%s260_s1 + $0x28] sm:$0xff]  ;;  %v21_v13 = vld [vmem:[%s260_s1 + $0x20] sm:$0xff] }
   0x5   :  { %144 = vmatprep.subr.mxu0 %v181_v0  ;;  %v20_v14 = vld [vmem:[%s260_s1 + $0x18] sm:$0xff]  ;;  %v19_v15 = vld [vmem:[%s260_s1 + $0x10] sm:$0xff]  ;;  %v18_v16 = vld [vmem:[%s260_s1 + $0x8] sm:$0xff] }
   0x6   :  { %145 = vmatpush3.msra.mxu0 %v30_v4  ;;  %v17_v17 = vld [vmem:[%s260_s1] sm:$0xff] }
   0x7   :  { %146 = vmatprep.subr.mxu0 %v181_v0  ;;  %v16_v18 = vld [vmem:[%s262_s0] sm:$0xff] }
   0x8   :  { %147 = vmatpush3.msra.mxu0 %v29_v5 }
   0x9   :  { %148 = vmatprep.subr.mxu0 %v181_v0  ;;  %v122_v19 = vld [vmem:[#allocation2] ss:$0 sm:$0xff] }
   0xa   :  { %149 = vmatpush3.msra.mxu0 %v28_v6 }
   0xb   :  { %150 = vmatprep.subr.mxu0 %v181_v0 }
   0xc   :  { %151 = vmatpush3.msra.mxu0 %v27_v7 }
   0xd   :  { %152 = vmatprep.subr.mxu0 %v181_v0 }
   0xe   :  { %153 = vmatpush3.msra.mxu0 %v26_v8 }
   0xf   :  { %154 = vmatprep.subr.mxu0 %v181_v0 }
  0x10   :  { %155 = vmatpush3.msra.mxu0 %v25_v9 }
  0x11   :  { %156 = vmatprep.subr.mxu0 %v181_v0 }
  0x12   :  { %157 = vmatpush3.msra.mxu0 %v24_v10 }
  0x13   :  { %158 = vmatprep.subr.mxu0 %v181_v0 }
  0x14   :  { %159 = vmatpush3.msra.mxu0 %v23_v11 }
  0x15   :  { %160 = vmatprep.subr.mxu0 %v181_v0 }
  0x16   :  { %161 = vmatpush3.msra.mxu0 %v22_v12 }
  0x17   :  { %162 = vmatprep.subr.mxu0 %v181_v0 }
  0x18   :  { %163 = vmatpush3.msra.mxu0 %v21_v13 }
  0x19   :  { %164 = vmatprep.subr.mxu0 %v181_v0 }
  0x1a   :  { %165 = vmatpush3.msra.mxu0 %v20_v14 }
  0x1b   :  { %166 = vmatprep.subr.mxu0 %v181_v0 }
  0x1c   :  { %167 = vmatpush3.msra.mxu0 %v19_v15 }
  0x1d   :  { %168 = vmatprep.subr.mxu0 %v181_v0 }
  0x1e   :  { %169 = vmatpush3.msra.mxu0 %v18_v16 }
  0x1f   :  { %170 = vmatprep.subr.mxu0 %v181_v0 }
  0x20   :  { %171 = vmatpush3.msra.mxu0 %v17_v17 }
  0x21   :  { %173 = vmatmul.mubr.f32.vlgmr.msra.gmra.mxu0 %v16_v18 }
  0xe1   :  { %v106_v20 = vpop.f32.mrf.mxu0 }
  0xe2   :  { %v107_v21 = vadd.f32 %v122_v19, %v106_v20 }
  0xe3   :  { %v174_v22 = vpop.f32.mrf.mxu0 }
  0xe4   :  { %v110_v23 = vsub.f32 0.0, %v107_v21 }
  0xe6   :  { %v111_v24 = vmul.f32 1.442695, %v110_v23 }
  0xe8   :  { %177 = vpow2.f32 %v111_v24 }
  0xf5   :  { %v178_v25 = vpop.eup %177 }
  0xf6   :  { %v113_v26 = vadd.f32 1.0, %v178_v25 }
  0xf8   :  { %179 = vrcp.f32 %v113_v26 }
 0x105   :  { %v180_v27 = vpop.eup %179 }
 0x106   :  { %117 = vst.msk [vmem:[%s263_s3] sm:$0xff] %vm116_vm1, %v180_v27 }

</bundles_post_ra>
